<compile_context>
chip_gen: v7x
topology: tpu7x:2x2x1
jax: 0.10.0
libtpu: 0.0.40
codegen_flags: <defaults>
</compile_context>

<pallas_src>
import math

import jax
import jax.numpy as jnp
from jax.experimental import pallas as pl
from jax.experimental.pallas import tpu as pltpu

HIDDEN = 16
MAX_TILE_B = 8192  # default lane-axis (batch) tile cap; multiple of 128


def dqn_kernel(x_ref, w1_ref, b1_ref, w2_ref, b2_ref, w3_ref, b3_ref,
               w4_ref, b4_ref, o_ref):
    hp = jax.lax.Precision.HIGHEST
    x = x_ref[...]                                       # (tile_b, in) f32, batch-major
    # Layer 1: contract the feature dim of BOTH operands -> feature-major
    # activations (16, tile_b); batch sits on the lane axis from here on.
    h = jax.lax.dot_general(w1_ref[...], x, (((1,), (1,)), ((), ())),
                            precision=hp, preferred_element_type=jnp.float32)
    h = jnp.maximum(h + b1_ref[...], 0.0)
    h = jnp.maximum(jnp.dot(w2_ref[...], h, precision=hp,
                            preferred_element_type=jnp.float32) + b2_ref[...], 0.0)
    h = jnp.maximum(jnp.dot(w3_ref[...], h, precision=hp,
                            preferred_element_type=jnp.float32) + b3_ref[...], 0.0)
    out = jnp.dot(w4_ref[...], h, precision=hp,
                  preferred_element_type=jnp.float32) + b4_ref[...]
    o_ref[...] = out                                     # (out, tile_b) f32, lane-dense


def dq_network_forward(x, params, *, max_tile_b=MAX_TILE_B):
    """x: (B, input_size) f32.  params: PyTorch layout (w: (out,in), b: (out,)).

    Returns (B, output_size) f32, matching DQNetwork.forward.
    """
    B, in_size = x.shape
    out_size = params["w4"].shape[0]

    # Batch tiling: round B up to 128 lanes, then split into the fewest tiles of
    # at most max_tile_b lanes.  B<=128 -> one 128-lane tile (small-batch path).
    granules = -(-B // 128)                              # ceil(B / 128)
    n_tiles = max(1, -(-(granules * 128) // max_tile_b))
    tile_b = -(-granules // n_tiles) * 128
    b_pad = n_tiles * tile_b

    xp = x.astype(jnp.float32)
    if b_pad != B:
        xp = jnp.pad(xp, ((0, b_pad - B), (0, 0)))       # padded rows sliced off below

    w1 = params["w1"].astype(jnp.float32)
    w2 = params["w2"].astype(jnp.float32)
    w3 = params["w3"].astype(jnp.float32)
    w4 = params["w4"].astype(jnp.float32)
    b1 = params["b1"].reshape(-1, 1).astype(jnp.float32)
    b2 = params["b2"].reshape(-1, 1).astype(jnp.float32)
    b3 = params["b3"].reshape(-1, 1).astype(jnp.float32)
    b4 = params["b4"].reshape(-1, 1).astype(jnp.float32)

    def resident(arr):
        # Constant index map -> full array resident in VMEM across the batch grid.
        return pl.BlockSpec(arr.shape, lambda i: (0, 0))

    out_t = pl.pallas_call(
        dqn_kernel,
        out_shape=jax.ShapeDtypeStruct((out_size, b_pad), jnp.float32),
        grid_spec=pltpu.PrefetchScalarGridSpec(
            num_scalar_prefetch=0,
            grid=(n_tiles,),
            in_specs=[
                pl.BlockSpec((tile_b, in_size), lambda i: (i, 0)),  # x tile (pipelined)
                resident(w1), resident(b1),
                resident(w2), resident(b2),
                resident(w3), resident(b3),
                resident(w4), resident(b4),
            ],
            out_specs=pl.BlockSpec((out_size, tile_b), lambda i: (0, i)),
        ),
        compiler_params=pltpu.CompilerParams(
            dimension_semantics=("parallel",),       # shard batch grid over 2 TCs (v7x)
            vmem_limit_bytes=32 * 1024 * 1024,
        ),
    )(xp, w1, b1, w2, b2, w3, b3, w4, b4)

    return out_t[:, :B].T                                # back to (B, out_size)


# ---------------- init (matches PyTorch DQNetwork) ----------------

def xavier_uniform(key, out_features, in_features):
    # torch.nn.init.xavier_uniform_ on a (out, in) weight.
    bound = math.sqrt(6.0 / (in_features + out_features))
    return jax.random.uniform(key, (out_features, in_features),
                              minval=-bound, maxval=bound, dtype=jnp.float32)


def default_bias(key, in_features, out_features):
    # PyTorch nn.Linear default bias init: U(-1/sqrt(in_features), 1/sqrt(in_features)).
    bound = 1.0 / math.sqrt(in_features)
    return jax.random.uniform(key, (out_features,),
                              minval=-bound, maxval=bound, dtype=jnp.float32)


def init_params(key, input_size, output_size, hidden=HIDDEN):
    keys = jax.random.split(key, 8)
    return {
        "w1": xavier_uniform(keys[0], hidden, input_size),
        "b1": default_bias(keys[1], input_size, hidden),
        "w2": xavier_uniform(keys[2], hidden, hidden),
        "b2": default_bias(keys[3], hidden, hidden),
        "w3": xavier_uniform(keys[4], hidden, hidden),
        "b3": default_bias(keys[5], hidden, hidden),
        "w4": xavier_uniform(keys[6], output_size, hidden),
        "b4": default_bias(keys[7], hidden, output_size),
    }


def reference_forward(x, p):
    # Plain f32 forward (same math as the PyTorch module), exact f32 matmuls.
    hp = jax.lax.Precision.HIGHEST
    def lin(h, w, b):
        return jnp.dot(h, w.T, precision=hp, preferred_element_type=jnp.float32) + b
    h = jnp.maximum(lin(x, p["w1"], p["b1"]), 0.0)
    h = jnp.maximum(lin(h, p["w2"], p["b2"]), 0.0)
    h = jnp.maximum(lin(h, p["w3"], p["b3"]), 0.0)
    return lin(h, p["w4"], p["b4"])


if __name__ == "__main__":
    input_size, output_size = 32, 8
    key = jax.random.PRNGKey(0)
    k_params, k_x1, k_x2 = jax.random.split(key, 3)
    params = init_params(k_params, input_size, output_size)

    # Small-batch path: B=8 -> a single 128-lane tile (the DQN act() case).
    x_small = jax.random.normal(k_x1, (8, input_size), dtype=jnp.float32)
    out_small = dq_network_forward(x_small, params)
    jax.block_until_ready(out_small)
    ref_small = reference_forward(x_small, params)
    assert out_small.shape == (8, output_size)
    assert jnp.allclose(out_small, ref_small, atol=2e-3, rtol=2e-3), \
        float(jnp.max(jnp.abs(out_small - ref_small)))

    # Multi-step grid path: B=300 with a forced 128-lane tile -> grid of 3 steps.
    x_big = jax.random.normal(k_x2, (300, input_size), dtype=jnp.float32)
    out_big = dq_network_forward(x_big, params, max_tile_b=128)
    jax.block_until_ready(out_big)
    ref_big = reference_forward(x_big, params)
    assert out_big.shape == (300, output_size)
    assert jnp.allclose(out_big, ref_big, atol=2e-3, rtol=2e-3), \
        float(jnp.max(jnp.abs(out_big - ref_big)))

    print("KERNEL_OK")
</pallas_src>

<mosaic_0001>
module attributes {stable_mosaic.version = 11 : i64} {
  func.func @dqn_kernel(%arg0: i32, %arg1: memref<128x32xf32, #tpu.memory_space<vmem>>, %arg2: memref<16x32xf32, #tpu.memory_space<vmem>>, %arg3: memref<16x1xf32, #tpu.memory_space<vmem>>, %arg4: memref<16x16xf32, #tpu.memory_space<vmem>>, %arg5: memref<16x1xf32, #tpu.memory_space<vmem>>, %arg6: memref<16x16xf32, #tpu.memory_space<vmem>>, %arg7: memref<16x1xf32, #tpu.memory_space<vmem>>, %arg8: memref<8x16xf32, #tpu.memory_space<vmem>>, %arg9: memref<8x1xf32, #tpu.memory_space<vmem>>, %arg10: memref<8x128xf32, #tpu.memory_space<vmem>>) attributes {dimension_semantics = [#tpu.dimension_semantics<parallel>], iteration_bounds = array<i64: 1>, scalar_prefetch = 0 : i64, scratch_operands = 0 : i64, tpu.core_type = #tpu.core_type<tc>, window_params = [{transform_indices = @transform_0, window_bounds = array<i64: 128, 32>}, {pipeline_mode = #tpu.pipeline_mode<synchronous>, transform_indices = @transform_1, window_bounds = array<i64: 16, 32>}, {pipeline_mode = #tpu.pipeline_mode<synchronous>, transform_indices = @transform_2, window_bounds = array<i64: 16, 1>}, {pipeline_mode = #tpu.pipeline_mode<synchronous>, transform_indices = @transform_3, window_bounds = array<i64: 16, 16>}, {pipeline_mode = #tpu.pipeline_mode<synchronous>, transform_indices = @transform_4, window_bounds = array<i64: 16, 1>}, {pipeline_mode = #tpu.pipeline_mode<synchronous>, transform_indices = @transform_5, window_bounds = array<i64: 16, 16>}, {pipeline_mode = #tpu.pipeline_mode<synchronous>, transform_indices = @transform_6, window_bounds = array<i64: 16, 1>}, {pipeline_mode = #tpu.pipeline_mode<synchronous>, transform_indices = @transform_7, window_bounds = array<i64: 8, 16>}, {pipeline_mode = #tpu.pipeline_mode<synchronous>, transform_indices = @transform_8, window_bounds = array<i64: 8, 1>}, {transform_indices = @transform_9, window_bounds = array<i64: 8, 128>}]} {
    %c0 = arith.constant 0 : index
    %c0_0 = arith.constant 0 : index
    %0 = vector.load %arg1[%c0, %c0_0] : memref<128x32xf32, #tpu.memory_space<vmem>>, vector<128x32xf32>
    %c0_1 = arith.constant 0 : index
    %c0_2 = arith.constant 0 : index
    %1 = vector.load %arg2[%c0_1, %c0_2] : memref<16x32xf32, #tpu.memory_space<vmem>>, vector<16x32xf32>
    %cst = arith.constant dense<0.000000e+00> : vector<16x128xf32>
    %2 = tpu.matmul %1, %0, %cst {dimension_numbers = #tpu.dot_dimension_numbers<[1], [1], [0], [0], [0, 0, 1, 0], [], []>, precision = #tpu.contract_precision<fp32>} : vector<16x32xf32>, vector<128x32xf32>, vector<16x128xf32> -> vector<16x128xf32>
    %c0_3 = arith.constant 0 : index
    %c0_4 = arith.constant 0 : index
    %3 = vector.load %arg3[%c0_3, %c0_4] : memref<16x1xf32, #tpu.memory_space<vmem>>, vector<16x1xf32>
    %4 = vector.broadcast %3 : vector<16x1xf32> to vector<16x128xf32>
    %5 = arith.addf %2, %4 : vector<16x128xf32>
    %cst_5 = arith.constant 0.000000e+00 : f32
    %6 = vector.broadcast %cst_5 : f32 to vector<16x128xf32>
    %7 = arith.maximumf %5, %6 : vector<16x128xf32>
    %c0_6 = arith.constant 0 : index
    %c0_7 = arith.constant 0 : index
    %8 = vector.load %arg4[%c0_6, %c0_7] : memref<16x16xf32, #tpu.memory_space<vmem>>, vector<16x16xf32>
    %cst_8 = arith.constant dense<0.000000e+00> : vector<16x128xf32>
    %9 = tpu.matmul %8, %7, %cst_8 {dimension_numbers = #tpu.dot_dimension_numbers<[1], [0], [0], [1], [0, 0, 1, 1], [], []>, precision = #tpu.contract_precision<fp32>} : vector<16x16xf32>, vector<16x128xf32>, vector<16x128xf32> -> vector<16x128xf32>
    %c0_9 = arith.constant 0 : index
    %c0_10 = arith.constant 0 : index
    %10 = vector.load %arg5[%c0_9, %c0_10] : memref<16x1xf32, #tpu.memory_space<vmem>>, vector<16x1xf32>
    %11 = vector.broadcast %10 : vector<16x1xf32> to vector<16x128xf32>
    %12 = arith.addf %9, %11 : vector<16x128xf32>
    %cst_11 = arith.constant 0.000000e+00 : f32
    %13 = vector.broadcast %cst_11 : f32 to vector<16x128xf32>
    %14 = arith.maximumf %12, %13 : vector<16x128xf32>
    %c0_12 = arith.constant 0 : index
    %c0_13 = arith.constant 0 : index
    %15 = vector.load %arg6[%c0_12, %c0_13] : memref<16x16xf32, #tpu.memory_space<vmem>>, vector<16x16xf32>
    %cst_14 = arith.constant dense<0.000000e+00> : vector<16x128xf32>
    %16 = tpu.matmul %15, %14, %cst_14 {dimension_numbers = #tpu.dot_dimension_numbers<[1], [0], [0], [1], [0, 0, 1, 1], [], []>, precision = #tpu.contract_precision<fp32>} : vector<16x16xf32>, vector<16x128xf32>, vector<16x128xf32> -> vector<16x128xf32>
    %c0_15 = arith.constant 0 : index
    %c0_16 = arith.constant 0 : index
    %17 = vector.load %arg7[%c0_15, %c0_16] : memref<16x1xf32, #tpu.memory_space<vmem>>, vector<16x1xf32>
    %18 = vector.broadcast %17 : vector<16x1xf32> to vector<16x128xf32>
    %19 = arith.addf %16, %18 : vector<16x128xf32>
    %cst_17 = arith.constant 0.000000e+00 : f32
    %20 = vector.broadcast %cst_17 : f32 to vector<16x128xf32>
    %21 = arith.maximumf %19, %20 : vector<16x128xf32>
    %c0_18 = arith.constant 0 : index
    %c0_19 = arith.constant 0 : index
    %22 = vector.load %arg8[%c0_18, %c0_19] : memref<8x16xf32, #tpu.memory_space<vmem>>, vector<8x16xf32>
    %cst_20 = arith.constant dense<0.000000e+00> : vector<8x128xf32>
    %23 = tpu.matmul %22, %21, %cst_20 {dimension_numbers = #tpu.dot_dimension_numbers<[1], [0], [0], [1], [0, 0, 1, 1], [], []>, precision = #tpu.contract_precision<fp32>} : vector<8x16xf32>, vector<16x128xf32>, vector<8x128xf32> -> vector<8x128xf32>
    %c0_21 = arith.constant 0 : index
    %c0_22 = arith.constant 0 : index
    %24 = vector.load %arg9[%c0_21, %c0_22] : memref<8x1xf32, #tpu.memory_space<vmem>>, vector<8x1xf32>
    %25 = vector.broadcast %24 : vector<8x1xf32> to vector<8x128xf32>
    %26 = arith.addf %23, %25 : vector<8x128xf32>
    %c0_23 = arith.constant 0 : index
    %c0_24 = arith.constant 0 : index
    %27 = vector.load %arg10[%c0_23, %c0_24] : memref<8x128xf32, #tpu.memory_space<vmem>>, vector<8x128xf32>
    tpu.vector_store %arg10[%c0_23, %c0_24], %26 {strides = array<i32>} : memref<8x128xf32, #tpu.memory_space<vmem>>, vector<8x128xf32>,
    return
  }
  func.func @transform_0(%arg0: i32) -> (i32, i32) {
    %c0_i32 = arith.constant 0 : i32
    %c0_i32_0 = arith.constant 0 : i32
    return %arg0, %c0_i32 : i32, i32
  }
  func.func @transform_1(%arg0: i32) -> (i32, i32) {
    %c0_i32 = arith.constant 0 : i32
    %c0_i32_0 = arith.constant 0 : i32
    %c0_i32_1 = arith.constant 0 : i32
    return %c0_i32, %c0_i32_0 : i32, i32
  }
  func.func @transform_2(%arg0: i32) -> (i32, i32) {
    %c0_i32 = arith.constant 0 : i32
    %c0_i32_0 = arith.constant 0 : i32
    %c0_i32_1 = arith.constant 0 : i32
    return %c0_i32, %c0_i32_0 : i32, i32
  }
  func.func @transform_3(%arg0: i32) -> (i32, i32) {
    %c0_i32 = arith.constant 0 : i32
    %c0_i32_0 = arith.constant 0 : i32
    %c0_i32_1 = arith.constant 0 : i32
    return %c0_i32, %c0_i32_0 : i32, i32
  }
  func.func @transform_4(%arg0: i32) -> (i32, i32) {
    %c0_i32 = arith.constant 0 : i32
    %c0_i32_0 = arith.constant 0 : i32
    %c0_i32_1 = arith.constant 0 : i32
    return %c0_i32, %c0_i32_0 : i32, i32
  }
  func.func @transform_5(%arg0: i32) -> (i32, i32) {
    %c0_i32 = arith.constant 0 : i32
    %c0_i32_0 = arith.constant 0 : i32
    %c0_i32_1 = arith.constant 0 : i32
    return %c0_i32, %c0_i32_0 : i32, i32
  }
  func.func @transform_6(%arg0: i32) -> (i32, i32) {
    %c0_i32 = arith.constant 0 : i32
    %c0_i32_0 = arith.constant 0 : i32
    %c0_i32_1 = arith.constant 0 : i32
    return %c0_i32, %c0_i32_0 : i32, i32
  }
  func.func @transform_7(%arg0: i32) -> (i32, i32) {
    %c0_i32 = arith.constant 0 : i32
    %c0_i32_0 = arith.constant 0 : i32
    %c0_i32_1 = arith.constant 0 : i32
    return %c0_i32, %c0_i32_0 : i32, i32
  }
  func.func @transform_8(%arg0: i32) -> (i32, i32) {
    %c0_i32 = arith.constant 0 : i32
    %c0_i32_0 = arith.constant 0 : i32
    %c0_i32_1 = arith.constant 0 : i32
    return %c0_i32, %c0_i32_0 : i32, i32
  }
  func.func @transform_9(%arg0: i32) -> (i32, i32) {
    %c0_i32 = arith.constant 0 : i32
    %c0_i32_0 = arith.constant 0 : i32
    return %c0_i32, %arg0 : i32, i32
  }
}

</mosaic_0001>

<bundles_post_ra>
// kernel: tpu_custom_call.1
= control target key start
LH: loop header
LB: loop body
LE: loop exit
PB: predicated region body
PF: predicated region fallthrough
CT: control target
= control target key end

     0   :  { %vm63_vm0 = vcmask 261120   ;;  %s3645_s0 = inlined_call_operand.vmem [shape: f32[128,32], index: 0, kind: input, shape index: {}]   ;;  %s3646_s1 = inlined_call_operand.vmem [shape: f32[16,32], index: 1, kind: input, shape index: {}]   ;;  %s3647_s2 = inlined_call_operand.vmem [shape: f32[16,1], index: 2, kind: input, shape index: {}]   ;;  %s3648_s3 = inlined_call_operand.vmem [shape: f32[16,16], index: 3, kind: input, shape index: {}]   ;;  %s3649_s4 = inlined_call_operand.vmem [shape: f32[16,1], index: 4, kind: input, shape index: {}]   ;;  %s3650_s5 = inlined_call_operand.vmem [shape: f32[16,16], index: 5, kind: input, shape index: {}]   ;;  %s3651_s6 = inlined_call_operand.vmem [shape: f32[16,1], index: 6, kind: input, shape index: {}]   ;;  %s3652_s7 = inlined_call_operand.vmem [shape: f32[8,16], index: 7, kind: input, shape index: {}]   ;;  %s3653_s8 = inlined_call_operand.vmem [shape: f32[8,1], index: 8, kind: input, shape index: {}]   ;;  %s3654_s9 = inlined_call_operand.hbm [shape: f32[8,128], index: 9, kind: output, shape index: {}]  }
   0x1   :  { %v33_v0 = vld [vmem:[%s3645_s0] sm:$0xff]  ;;  %v34_v1 = vld [vmem:[%s3645_s0 + $0x8] sm:$0xff]  ;;  %v35_v2 = vld [vmem:[%s3645_s0 + $0x10] sm:$0xff] }
   0x2   :  { %v71_v3 = vsel %vm63_vm0, %v33_v0, 0  ;;  %v74_v4 = vsel %vm63_vm0, %v34_v1, 0  ;;  %v36_v5 = vld [vmem:[%s3645_s0 + $0x18] sm:$0xff]  ;;  %v77_v6 = vsel %vm63_vm0, %v35_v2, 0  ;;  %v37_v7 = vld [vmem:[%s3645_s0 + $0x20] sm:$0xff]  ;;  %v38_v8 = vld [vmem:[%s3645_s0 + $0x28] sm:$0xff] }
   0x3   :  { %v119_v9 = vand.u32 4294901760, %v71_v3  ;;  %v122_v10 = vand.u32 4294901760, %v74_v4  ;;  %v80_v11 = vsel %vm63_vm0, %v36_v5, 0  ;;  %v125_v12 = vand.u32 4294901760, %v77_v6  ;;  %v39_v26 = vld [vmem:[%s3645_s0 + $0x30] sm:$0xff]  ;;  %v40_v27 = vld [vmem:[%s3645_s0 + $0x38] sm:$0xff] }
   0x4   :  { %v128_v13 = vand.u32 4294901760, %v80_v11  ;;  %v83_v14 = vsel %vm63_vm0, %v37_v7, 0  ;;  %v86_v15 = vsel %vm63_vm0, %v38_v8, 0 }
   0x5   :  { %v3262_v16 = vpack.c.bf16 %v122_v10, %v119_v9  ;;  %v3264_v17 = vsub.f32 %v71_v3, %v119_v9  ;;  %v3266_v18 = vsub.f32 %v74_v4, %v122_v10  ;;  %v3268_v19 = vsub.f32 %v77_v6, %v125_v12 }
   0x6   :  { %v3270_v20 = vpack.c.bf16 %v128_v13, %v125_v12  ;;  %v3272_v21 = vsub.f32 %v80_v11, %v128_v13  ;;  %v131_v23 = vand.u32 4294901760, %v83_v14  ;;  %v134_v24 = vand.u32 4294901760, %v86_v15 }
   0x7   :  { %v2911_v22 = vpack.c.bf16 %v3266_v18, %v3264_v17  ;;  %2848 = vmatprep.subr.bf16.mxu1 %v3262_v16 }
   0x8   :  { %v2915_v25 = vpack.c.bf16 %v3272_v21, %v3268_v19  ;;  %2850 = vmatpush3.bf16.xpose.msra.mxu1 %v3262_v16 }
   0x9   :  { %14 = vsyncpa [#allocation3], 0  ;;  %2912 = vmatprep.subr.bf16.mxu0 %v2911_v22  ;;  %2852 = vmatprep.subr.bf16.mxu1 %v3270_v20  ;;  %v3287_v28 = vsub.f32 %v83_v14, %v131_v23  ;;  %v3289_v29 = vsub.f32 %v86_v15, %v134_v24  ;;  %v89_v30 = vsel %vm63_vm0, %v39_v26, 0  ;;  %v92_v31 = vsel %vm63_vm0, %v40_v27, 0  ;;  %v49_v32 = vld [vmem:[%s3646_s1] sm:$0xff]  ;;  %v42_v39 = vld [vmem:[%s3645_s0 + $0x48] sm:$0xff] }
   0xa   :  { %2914 = vmatpush3.bf16.xpose.msra.mxu0 %v2911_v22  ;;  %v3296_v33 = vpack.c.bf16 %v134_v24, %v131_v23  ;;  %v137_v34 = vand.u32 4294901760, %v89_v30  ;;  %v140_v35 = vand.u32 4294901760, %v92_v31  ;;  %v65_v37 = vsel %vm63_vm0, %v49_v32, 0  ;;  %v41_v38 = vld [vmem:[%s3645_s0 + $0x40] sm:$0xff]  ;;  %v43_v60 = vld [vmem:[%s3645_s0 + $0x50] sm:$0xff]  ;;  %v44_v61 = vld [vmem:[%s3645_s0 + $0x58] sm:$0xff] }
   0xb   :  { %2916 = vmatprep.subr.bf16.mxu0 %v2915_v25  ;;  %v2919_v36 = vpack.c.bf16 %v3289_v29, %v3287_v28  ;;  %v3308_v40 = vand.u32 4294901760, %v65_v37  ;;  %v222_v43 = vand.u32 4294901760, %v3264_v17  ;;  %v229_v44 = vand.u32 4294901760, %v3266_v18  ;;  %v45_v13 = vld [vmem:[%s3645_s0 + $0x60] sm:$0xff]  ;;  %v46_v14 = vld [vmem:[%s3645_s0 + $0x68] sm:$0xff] }
   0xc   :  { %v3311_v41 = vsub.f32 %v89_v30, %v137_v34  ;;  %v3313_v42 = vsub.f32 %v92_v31, %v140_v35  ;;  %v95_v45 = vsel %vm63_vm0, %v41_v38, 0  ;;  %v98_v46 = vsel %vm63_vm0, %v42_v39, 0 }
   0xd   :  { %v3320_v47 = vsub.f32 %v65_v37, %v3308_v40  ;;  %v3326_v48 = vpack.c.bf16 %v229_v44, %v222_v43  ;;  %v3328_v49 = vpack.c.bf16 %v140_v35, %v137_v34  ;;  %v236_v51 = vand.u32 4294901760, %v3268_v19  ;;  %v47_v35 = vld [vmem:[%s3645_s0 + $0x70] sm:$0xff] }
   0xe   :  { %v243_v52 = vand.u32 4294901760, %v3272_v21  ;;  %v2923_v53 = vpack.c.bf16 %v3313_v42, %v3311_v41  ;;  %v143_v54 = vand.u32 4294901760, %v95_v45  ;;  %v146_v55 = vand.u32 4294901760, %v98_v46 }
   0xf   :  { %2613 = vmatprep.mubr.f32.mxu0 %v3320_v47  ;;  %v201_v50 = vand.u32 4294901760, %v3320_v47  ;;  %v250_v58 = vand.u32 4294901760, %v3287_v28  ;;  %v257_v59 = vand.u32 4294901760, %v3289_v29  ;;  %v264_v0 = vand.u32 4294901760, %v3311_v41 }
  0x10   :  { %2854 = vmatpush3.bf16.xpose.msra.mxu1 %v3270_v20  ;;  %v3343_v57 = vpack.c.bf16 %v243_v52, %v236_v51  ;;  %v271_v1 = vand.u32 4294901760, %v3313_v42  ;;  %v3363_v2 = vsub.f32 %v95_v45, %v143_v54  ;;  %v3365_v3 = vsub.f32 %v98_v46, %v146_v55 }
  0x11   :  { %2856 = vmatprep.subr.bf16.mxu1 %v3296_v33  ;;  %v202_v56 = vsub.f32 %v3320_v47, %v201_v50  ;;  %v3359_v63 = vpack.c.bf16 %v257_v59, %v250_v58  ;;  %v101_v4 = vsel %vm63_vm0, %v43_v60, 0  ;;  %v104_v5 = vsel %vm63_vm0, %v44_v61, 0  ;;  %v50_v60 = vld [vmem:[%s3646_s1 + $0x8] sm:$0xff] }
  0x12   :  { %2918 = vmatpush3.bf16.xpose.msra.mxu0 %v2915_v25  ;;  %v3373_v6 = vpack.c.bf16 %v271_v1, %v264_v0  ;;  %v3375_v7 = vpack.c.bf16 %v146_v55, %v143_v54  ;;  %v2927_v8 = vpack.c.bf16 %v3365_v3, %v3363_v2  ;;  %v149_v9 = vand.u32 4294901760, %v101_v4 }
  0x13   :  { %2920 = vmatprep.subr.bf16.mxu0 %v2919_v36  ;;  %v203_v62 = vand.u32 4294901760, %v202_v56  ;;  %v152_v10 = vand.u32 4294901760, %v104_v5  ;;  %v278_v11 = vand.u32 4294901760, %v3363_v2  ;;  %v285_v12 = vand.u32 4294901760, %v3365_v3 }
  0x14   :  { %v3395_v22 = vsub.f32 %v101_v4, %v149_v9  ;;  %v107_v24 = vsel %vm63_vm0, %v45_v13, 0  ;;  %v110_v25 = vsel %vm63_vm0, %v46_v14, 0  ;;  %v113_v45 = vsel %vm63_vm0, %v47_v35, 0 }
  0x15   :  { %2543 = vmatprep.mubr.f32.mxu1 %v203_v62  ;;  %v3393_v15 = vpack.c.bf16 %v285_v12, %v278_v11  ;;  %v3397_v23 = vsub.f32 %v104_v5, %v152_v10  ;;  %v3401_v26 = vpack.c.bf16 %v152_v10, %v149_v9  ;;  %v155_v30 = vand.u32 4294901760, %v107_v24 }
  0x16   :  { %v158_v31 = vand.u32 4294901760, %v110_v25  ;;  %v292_v32 = vand.u32 4294901760, %v3395_v22  ;;  %v161_v55 = vand.u32 4294901760, %v113_v45  ;;  %v68_v4 = vsel %vm63_vm0, %v50_v60, 0 }
  0x17   :  { %v2931_v27 = vpack.c.bf16 %v3397_v23, %v3395_v22  ;;  %v299_v34 = vand.u32 4294901760, %v3397_v23  ;;  %v3421_v38 = vsub.f32 %v107_v24, %v155_v30  ;;  %v3451_v13 = vand.u32 4294901760, %v68_v4 }
  0x18   :  { %2858 = vmatpush3.bf16.xpose.msra.mxu1 %v3296_v33  ;;  %v3423_v39 = vsub.f32 %v110_v25, %v158_v31  ;;  %v223_v14 = vsub.f32 %v3264_v17, %v222_v43  ;;  %v230_v24 = vsub.f32 %v3266_v18, %v229_v44  ;;  %vm818_vm1 = vcmask 130048  }
  0x19   :  { %2860 = vmatprep.subr.bf16.mxu1 %v3328_v49  ;;  %v3419_v37 = vpack.c.bf16 %v299_v34, %v292_v32  ;;  %v306_v61 = vand.u32 4294901760, %v3421_v38  ;;  %vm3185_vm2 = vmmov 0  }
  0x1a   :  { %2922 = vmatpush3.bf16.xpose.msra.mxu0 %v2919_v36  ;;  %v48_v36 = vld [vmem:[%s3645_s0 + $0x78] sm:$0xff]  ;;  %v2935_v54 = vpack.c.bf16 %v3423_v39, %v3421_v38  ;;  %v313_v62 = vand.u32 4294901760, %v3423_v39  ;;  %v224_v35 = vand.u32 4294901760, %v223_v14  ;;  %v231_v17 = vand.u32 4294901760, %v230_v24 }
  0x1b   :  { %2924 = vmatprep.subr.bf16.mxu0 %v2923_v53  ;;  %v116_v46 = vsel %vm63_vm0, %v48_v36, 0  ;;  %v237_v36 = vsub.f32 %v3268_v19, %v236_v51  ;;  %v251_v19 = vsub.f32 %v3287_v28, %v250_v58  ;;  %v272_v58 = vsub.f32 %v3313_v42, %v271_v1 }
  0x1c   :  { %v164_v56 = vand.u32 4294901760, %v116_v46  ;;  %v3443_v5 = vpack.c.bf16 %v313_v62, %v306_v61  ;;  %v2879_v44 = vpack.c.bf16 %v231_v17, %v224_v35  ;;  %v293_v14 = vsub.f32 %v3395_v22, %v292_v32 }
  0x1d   :  { %v252_v51 = vand.u32 4294901760, %v251_v19  ;;  %v307_v24 = vsub.f32 %v3421_v38, %v306_v61  ;;  %v314_v22 = vsub.f32 %v3423_v39, %v313_v62 }
  0x1e   :  { %v3447_v9 = vsub.f32 %v116_v46, %v164_v56  ;;  %v3449_v10 = vpack.c.bf16 %v164_v56, %v161_v55 }
  0x1f   :  { %v315_v32 = vand.u32 4294901760, %v314_v22  ;;  %v1330_v22 = vld [vmem:[%s3650_s5 + $0x8] sm:$0xff] }
  0x20   :  { %2862 = vmatpush3.bf16.xpose.msra.mxu1 %v3328_v49 }
  0x21   :  { %2864 = vmatprep.subr.bf16.mxu1 %v3375_v7 }
  0x22   :  { %2926 = vmatpush3.bf16.xpose.msra.mxu0 %v2923_v53  ;;  %v3427_v53 = vpack.c.bf16 %v158_v31, %v155_v30  ;;  %v327_v30 = vand.u32 4294901760, %v3447_v9  ;;  %v3465_v31 = vsub.f32 %v68_v4, %v3451_v13  ;;  %v273_v4 = vand.u32 4294901760, %v272_v58 }
  0x23   :  { %2928 = vmatprep.subr.bf16.mxu0 %v2927_v8 }
  0x24   :  { %v211_v43 = vand.u32 4294901760, %v3465_v31  ;;  %v328_v38 = vsub.f32 %v3447_v9, %v327_v30 }
  0x26   :  { %v212_v46 = vsub.f32 %v3465_v31, %v211_v43  ;;  %v329_v61 = vand.u32 4294901760, %v328_v38 }
  0x28   :  { %2866 = vmatpush3.bf16.xpose.msra.mxu1 %v3375_v7  ;;  %v213_v56 = vand.u32 4294901760, %v212_v46 }
  0x29   :  { %2868 = vmatprep.subr.bf16.mxu1 %v3401_v26 }
  0x2a   :  { %2930 = vmatpush3.bf16.xpose.msra.mxu0 %v2927_v8  ;;  %v3445_v8 = vsub.f32 %v113_v45, %v161_v55  ;;  %v244_v45 = vsub.f32 %v3272_v21, %v243_v52  ;;  %v258_v21 = vsub.f32 %v3289_v29, %v257_v59  ;;  %v265_v29 = vsub.f32 %v3311_v41, %v264_v0 }
  0x2b   :  { %2932 = vmatprep.subr.bf16.mxu0 %v2931_v27  ;;  %v286_v41 = vsub.f32 %v3365_v3, %v285_v12  ;;  %v294_v3 = vand.u32 4294901760, %v293_v14 }
  0x2c   :  { %v2939_v25 = vpack.c.bf16 %v3447_v9, %v3445_v8  ;;  %v245_v55 = vand.u32 4294901760, %v244_v45  ;;  %v259_v52 = vand.u32 4294901760, %v258_v21  ;;  %v266_v59 = vand.u32 4294901760, %v265_v29 }
  0x2d   :  { %v287_v0 = vand.u32 4294901760, %v286_v41  ;;  %v3183_v9 = vmov 0  }
  0x2e   :  { %v2887_v28 = vpack.c.bf16 %v259_v52, %v252_v51  ;;  %v2891_v47 = vpack.c.bf16 %v273_v4, %v266_v59  ;;  %3157 = vset.pattern.permute.xlu0 %v3183_v9  ;;  %3158 = vset.pattern.permute.xlu1 %v3183_v9 }
  0x30   :  { %2870 = vmatpush3.bf16.xpose.msra.mxu1 %v3401_v26 }
  0x31   :  { %2872 = vmatprep.subr.bf16.mxu1 %v3427_v53 }
  0x32   :  { %2934 = vmatpush3.bf16.xpose.msra.mxu0 %v2931_v27  ;;  %v320_v27 = vand.u32 4294901760, %v3445_v8 }
  0x33   :  { %2936 = vmatprep.subr.bf16.mxu0 %v2935_v54 }
  0x34   :  { %v3472_v18 = vpack.c.bf16 %v327_v30, %v320_v27  ;;  %v1331_v30 = vld [vmem:[%s3651_s6] sm:$0xff] }
  0x38   :  { %2874 = vmatpush3.bf16.xpose.msra.mxu1 %v3427_v53 }
  0x39   :  { %2876 = vmatprep.subr.bf16.mxu1 %v3449_v10 }
  0x3a   :  { %2938 = vmatpush3.bf16.xpose.msra.mxu0 %v2935_v54  ;;  %v238_v54 = vand.u32 4294901760, %v237_v36 }
  0x3b   :  { %2940 = vmatprep.subr.bf16.mxu0 %v2939_v25 }
  0x3c   :  { %v2883_v60 = vpack.c.bf16 %v245_v55, %v238_v54 }
  0x40   :  { %2878 = vmatpush3.bf16.xpose.msra.mxu1 %v3449_v10 }
  0x41   :  { %2880 = vmatprep.subr.bf16.mxu1 %v2879_v44 }
  0x42   :  { %2942 = vmatpush3.bf16.xpose.msra.mxu0 %v2939_v25  ;;  %v321_v25 = vsub.f32 %v3445_v8, %v320_v27  ;;  %v51_v8 = vld [vmem:[%s3647_s2] sm:$0xff]  ;;  %v52_v27 = vld [vmem:[%s3647_s2 + $0x8] sm:$0xff] }
  0x43   :  { %2944 = vmatprep.subr.bf16.mxu0 %v3262_v16  ;;  %55 = vperm.xlu0 %3157, %v51_v8  }
  0x44   :  { %v322_v39 = vand.u32 4294901760, %v321_v25 }
  0x46   :  { %v2907_v62 = vpack.c.bf16 %v329_v61, %v322_v39 }
  0x47   :  { %2544 = vmatmul.mubr.f32.vlgmr.msra.gmra.mrb[0].mxu1 %v213_v56  ;;  %60 = vperm.xlu0 %3157, %v52_v27  }
  0x48   :  { %2882 = vmatpush3.bf16.xpose.msra.mxu1 %v2879_v44  ;;  %2578 = vmatprep.mubr.f32.mxu1 %v3308_v40 }
  0x49   :  { %2614 = vmatmul.mubr.f32.vlgmr.msra.gmra.mrb[0].mxu0 %v3465_v31  ;;  %2884 = vmatprep.subr.bf16.mxu1 %v2883_v60 }
  0x4a   :  { %2946 = vmatpush3.bf16.xpose.msra.mxu0 %v3262_v16  ;;  %2648 = vmatprep.mubr.f32.mxu0 %v201_v50  ;;  %v279_v50 = vsub.f32 %v3363_v2, %v278_v11  ;;  %v300_v2 = vsub.f32 %v3397_v23, %v299_v34  ;;  %v308_v23 = vand.u32 4294901760, %v307_v24 }
  0x4b   :  { %2948 = vmatprep.subr.bf16.mxu0 %v3270_v20  ;;  %1335 = vperm.xlu0 %3157, %v1331_v30  }
  0x4c   :  { %v280_v42 = vand.u32 4294901760, %v279_v50  ;;  %v301_v11 = vand.u32 4294901760, %v300_v2  ;;  %v2903_v34 = vpack.c.bf16 %v315_v32, %v308_v23  ;;  %v1347_v23 = vsel %vm818_vm1, %v1330_v22, 0 }
  0x4e   :  { %v2895_v1 = vpack.c.bf16 %v287_v0, %v280_v42  ;;  %v2899_v12 = vpack.c.bf16 %v301_v11, %v294_v3 }
  0x50   :  { %2886 = vmatpush3.bf16.xpose.msra.mxu1 %v2883_v60 }
  0x51   :  { %2888 = vmatprep.subr.bf16.mxu1 %v2887_v28 }
  0x52   :  { %2950 = vmatpush3.bf16.xpose.msra.mxu0 %v3270_v20 }
  0x53   :  { %2952 = vmatprep.subr.bf16.mxu0 %v3296_v33 }
  0x58   :  { %2890 = vmatpush3.bf16.xpose.msra.mxu1 %v2887_v28 }
  0x59   :  { %2892 = vmatprep.subr.bf16.mxu1 %v2891_v47 }
  0x5a   :  { %2954 = vmatpush3.bf16.xpose.msra.mxu0 %v3296_v33 }
  0x5b   :  { %2956 = vmatprep.subr.bf16.mxu0 %v3328_v49 }
  0x60   :  { %2894 = vmatpush3.bf16.xpose.msra.mxu1 %v2891_v47 }
  0x61   :  { %2896 = vmatprep.subr.bf16.mxu1 %v2895_v1 }
  0x62   :  { %2958 = vmatpush3.bf16.xpose.msra.mxu0 %v3328_v49 }
  0x63   :  { %2960 = vmatprep.subr.bf16.mxu0 %v3375_v7 }
  0x68   :  { %2898 = vmatpush3.bf16.xpose.msra.mxu1 %v2895_v1  ;;  %v1329_v1 = vld [vmem:[%s3650_s5] sm:$0xff] }
  0x69   :  { %2900 = vmatprep.subr.bf16.mxu1 %v2899_v12  ;;  %v1344_v14 = vsel %vm818_vm1, %v1329_v1, 0 }
  0x6a   :  { %2962 = vmatpush3.bf16.xpose.msra.mxu0 %v3375_v7  ;;  %v1416_v2 = vand.u32 4294901760, %v1344_v14 }
  0x6b   :  { %2964 = vmatprep.subr.bf16.mxu0 %v3401_v26 }
  0x6c   :  { %v1417_v3 = vsub.f32 %v1344_v14, %v1416_v2 }
  0x6e   :  { %v1418_v11 = vand.u32 4294901760, %v1417_v3 }
  0x70   :  { %2902 = vmatpush3.bf16.xpose.msra.mxu1 %v2899_v12  ;;  %v1419_v12 = vsub.f32 %v1417_v3, %v1418_v11 }
  0x71   :  { %2904 = vmatprep.subr.bf16.mxu1 %v2903_v34 }
  0x72   :  { %2966 = vmatpush3.bf16.xpose.msra.mxu0 %v3401_v26  ;;  %v1420_v24 = vand.u32 4294901760, %v1419_v12 }
  0x73   :  { %2968 = vmatprep.subr.bf16.mxu0 %v3427_v53 }
  0x78   :  { %2906 = vmatpush3.bf16.xpose.msra.mxu1 %v2903_v34  ;;  %v1426_v34 = vand.u32 4294901760, %v1347_v23 }
  0x79   :  { %2908 = vmatprep.subr.bf16.mxu1 %v2907_v62 }
  0x7a   :  { %2970 = vmatpush3.bf16.xpose.msra.mxu0 %v3427_v53  ;;  %v1427_v25 = vsub.f32 %v1347_v23, %v1426_v34 }
  0x7b   :  { %2972 = vmatprep.subr.bf16.mxu0 %v3449_v10 }
  0x7c   :  { %v1428_v9 = vand.u32 4294901760, %v1427_v25 }
  0x80   :  { %2910 = vmatpush3.bf16.xpose.msra.mxu1 %v2907_v62 }
  0x82   :  { %2974 = vmatpush3.bf16.xpose.msra.mxu0 %v3449_v10 }
  0x83   :  { %2976 = vmatprep.subr.bf16.mxu0 %v3326_v48 }
  0x87   :  { %2579 = vmatmul.mubr.f32.vlgmr.msra.gmra.mrb[0].mxu1 %v3451_v13 }
  0x89   :  { %2649 = vmatmul.mubr.f32.vlgmr.msra.gmra.mrb[0].mxu0 %v211_v43 }
  0x8a   :  { %2978 = vmatpush3.bf16.xpose.msra.mxu0 %v3326_v48  ;;  %2683 = vmatprep.mubr.f32.mxu0 %v3308_v40  ;;  %v1854_v48 = vld [vmem:[%s3653_s8] sm:$0xff] }
  0x8b   :  { %2980 = vmatprep.subr.bf16.mxu0 %v3343_v57  ;;  %1857 = vperm.xlu0 %3157, %v1854_v48  }
  0x92   :  { %2982 = vmatpush3.bf16.xpose.msra.mxu0 %v3343_v57 }
  0x93   :  { %2984 = vmatprep.subr.bf16.mxu0 %v3359_v63 }
  0x9a   :  { %2986 = vmatpush3.bf16.xpose.msra.mxu0 %v3359_v63 }
  0x9b   :  { %2988 = vmatprep.subr.bf16.mxu0 %v3373_v6 }
  0xa2   :  { %2990 = vmatpush3.bf16.xpose.msra.mxu0 %v3373_v6 }
  0xa3   :  { %2992 = vmatprep.subr.bf16.mxu0 %v3393_v15 }
  0xaa   :  { %2994 = vmatpush3.bf16.xpose.msra.mxu0 %v3393_v15  ;;  %v806_v15 = vld [vmem:[%s3649_s4] sm:$0xff] }
  0xab   :  { %2996 = vmatprep.subr.bf16.mxu0 %v3419_v37  ;;  %810 = vperm.xlu1 %3158, %v806_v15  }
  0xb2   :  { %2998 = vmatpush3.bf16.xpose.msra.mxu0 %v3419_v37  ;;  %v1332_v37 = vld [vmem:[%s3651_s6 + $0x8] sm:$0xff] }
  0xb3   :  { %3000 = vmatprep.subr.bf16.mxu0 %v3443_v5 }
  0xba   :  { %3002 = vmatpush3.bf16.xpose.msra.mxu0 %v3443_v5 }
  0xbb   :  { %3004 = vmatprep.subr.bf16.mxu0 %v3472_v18 }
  0xc2   :  { %3006 = vmatpush3.bf16.xpose.msra.mxu0 %v3472_v18  ;;  %v56_v5 = vpop.permute.xlu0 %55 }
  0xc3   :  { %3008 = vmatprep.subr.bf16.mxu0 %v3262_v16 }
  0xc6   :  { %v61_v31 = vpop.permute.xlu0 %60 }
  0xc9   :  { %2684 = vmatmul.mubr.f32.vlgmr.msra.gmra.mrb[0].mxu0 %v3451_v13 }
  0xca   :  { %3010 = vmatpush3.bf16.xpose.msra.mxu0 %v3262_v16  ;;  %2718 = vmatprep.mubr.f32.mxu0 %v3308_v40 }
  0xcb   :  { %3012 = vmatprep.subr.bf16.mxu0 %v3270_v20 }
  0xd2   :  { %3014 = vmatpush3.bf16.xpose.msra.mxu0 %v3270_v20 }
  0xd3   :  { %3016 = vmatprep.subr.bf16.mxu0 %v3296_v33 }
  0xda   :  { %3018 = vmatpush3.bf16.xpose.msra.mxu0 %v3296_v33  ;;  %v804_v33 = vld [vmem:[%s3648_s3] sm:$0xff] }
  0xdb   :  { %3020 = vmatprep.subr.bf16.mxu0 %v3328_v49  ;;  %v820_v40 = vsel %vm818_vm1, %v804_v33, 0 }
  0xe2   :  { %3022 = vmatpush3.bf16.xpose.msra.mxu0 %v3328_v49  ;;  %v3596_v49 = vand.u32 4294901760, %v820_v40 }
  0xe3   :  { %3024 = vmatprep.subr.bf16.mxu0 %v3375_v7 }
  0xe4   :  { %v893_v57 = vsub.f32 %v820_v40, %v3596_v49 }
  0xe6   :  { %v894_v63 = vand.u32 4294901760, %v893_v57 }
  0xe8   :  { %v895_v6 = vsub.f32 %v893_v57, %v894_v63 }
  0xea   :  { %3026 = vmatpush3.bf16.xpose.msra.mxu0 %v3375_v7  ;;  %v896_v7 = vand.u32 4294901760, %v895_v6 }
  0xeb   :  { %3028 = vmatprep.subr.bf16.mxu0 %v3401_v26 }
  0xec   :  { %2725 = vmatprep.mubr.f32.mxu1 %v896_v7 }
  0xf2   :  { %3030 = vmatpush3.bf16.xpose.msra.mxu0 %v3401_v26  ;;  %v807_v26 = vld [vmem:[%s3649_s4 + $0x8] sm:$0xff] }
  0xf3   :  { %3032 = vmatprep.subr.bf16.mxu0 %v3427_v53  ;;  %815 = vperm.xlu1 %3158, %v807_v26  }
  0xf7   :  { %1340 = vperm.xlu1 %3158, %v1332_v37  }
  0xfa   :  { %3034 = vmatpush3.bf16.xpose.msra.mxu0 %v3427_v53  ;;  %v805_v53 = vld [vmem:[%s3648_s3 + $0x8] sm:$0xff] }
  0xfb   :  { %3036 = vmatprep.subr.bf16.mxu0 %v3449_v10 }
 0x102   :  { %3038 = vmatpush3.bf16.xpose.msra.mxu0 %v3449_v10  ;;  %v823_v10 = vsel %vm818_vm1, %v805_v53, 0 }
 0x109   :  { %2719 = vmatmul.mubr.f32.vlgmr.msra.gmra.mrb[0].mxu0 %v3451_v13  ;;  %v902_v13 = vand.u32 4294901760, %v823_v10 }
 0x10b   :  { %v903_v35 = vsub.f32 %v823_v10, %v902_v13 }
 0x10d   :  { %v904_v46 = vand.u32 4294901760, %v903_v35 }
 0x10f   :  { %v905_v19 = vsub.f32 %v903_v35, %v904_v46 }
 0x111   :  { %v906_v58 = vand.u32 4294901760, %v905_v19 }
 0x12a   :  { %v811_v32 = vpop.permute.xlu1 %810 }
 0x15a   :  { %v2580_v16 = vpop.f32.mrb[0].mxu1 }
 0x15b   :  { %v366_v20 = vpop.f32.mrb[1].mxu1  ;;  %v3105_v17 = vadd.f32 %v2580_v16, %v61_v31  ;;  %v3186_v31 = vmov 0.0  }
 0x15c   :  { %v3107_v18 = vadd.f32 %v366_v20, %v56_v5  ;;  %v1429_v20 = vsub.f32 %v1427_v25, %v1428_v9 }
 0x15e   :  { %v1430_v6 = vand.u32 4294901760, %v1429_v20 }
 0x172   :  { %v816_v38 = vpop.permute.xlu1 %815 }
 0x1dc   :  { %v2720_v43 = vpop.f32.mrb[0].mxu0 }
 0x1dd   :  { %v3106_v44 = vadd.f32 %v3105_v17, %v2720_v43  ;;  %v792_v36 = vpop.f32.mrb[1].mxu0 }
 0x1de   :  { %v3108_v45 = vadd.f32 %v3107_v18, %v792_v36 }
 0x1df   :  { %v803_v54 = vmax.f32 %v3106_v44, 0.0  ;;  %v1341_v44 = vpop.permute.xlu1 %1340 }
 0x1e0   :  { %v802_v55 = vmax.f32 %v3108_v45, 0.0  ;;  %v1336_v45 = vpop.permute.xlu0 %1335 }
 0x1e1   :  { %v829_v56 = vand.u32 4294901760, %v803_v54 }
 0x1e2   :  { %v826_v60 = vand.u32 4294901760, %v802_v55 }
 0x1e3   :  { %v921_v21 = vsub.f32 %v803_v54, %v829_v56 }
 0x1e4   :  { %v3039_v51 = vpack.c.bf16 %v829_v56, %v826_v60  ;;  %v914_v52 = vsub.f32 %v802_v55, %v826_v60 }
 0x1e5   :  { %v922_v28 = vand.u32 4294901760, %v921_v21 }
 0x1e6   :  { %v915_v29 = vand.u32 4294901760, %v914_v52  ;;  %3040 = vmatprep.subr.bf16.mxu1 %v3039_v51  ;;  %v3047_v59 = vpack.c.bf16 %v921_v21, %v914_v52 }
 0x1e7   :  { %3042 = vmatpush3.bf16.msra.mxu1 %v3039_v51  ;;  %v923_v4 = vsub.f32 %v921_v21, %v922_v28 }
 0x1e8   :  { %v916_v47 = vsub.f32 %v914_v52, %v915_v29  ;;  %v3055_v50 = vpack.c.bf16 %v922_v28, %v915_v29 }
 0x1e9   :  { %v924_v41 = vand.u32 4294901760, %v923_v4 }
 0x1ea   :  { %2726 = vmatmul.mubr.f32.vlgmr.msra.gmra.mrb[2].mxu1 %v906_v58  ;;  %v917_v42 = vand.u32 4294901760, %v916_v47 }
 0x1eb   :  { %2732 = vmatprep.mubr.f32.mxu1 %v3596_v49 }
 0x1ec   :  { %v3043_v0 = vpack.c.bf16 %v924_v41, %v917_v42 }
 0x1ee   :  { %3044 = vmatprep.subr.bf16.mxu1 %v3043_v0 }
 0x1ef   :  { %3046 = vmatpush3.bf16.msra.mxu1 %v3043_v0 }
 0x1f0   :  { %3048 = vmatprep.subr.bf16.mxu1 %v3047_v59 }
 0x1f2   :  { %2733 = vmatmul.mubr.f32.vlgmr.msra.gmra.mrb[2].mxu1 %v902_v13 }
 0x1f3   :  { %3050 = vmatpush3.bf16.msra.mxu1 %v3047_v59  ;;  %2739 = vmatprep.mubr.f32.mxu1 %v893_v57 }
 0x1f4   :  { %3052 = vmatprep.subr.bf16.mxu1 %v3039_v51 }
 0x1fa   :  { %2740 = vmatmul.mubr.f32.vlgmr.msra.gmra.mrb[2].mxu1 %v903_v35  ;;  %v1853_v35 = vld [vmem:[%s3652_s7] sm:$0xff]  ;;  %s3187_s7 = smov [#allocation2]  }
 0x1fb   :  { %3054 = vmatpush3.bf16.msra.mxu1 %v3039_v51  ;;  %2746 = vmatprep.mubr.f32.mxu1 %v894_v63  ;;  %v1861_v17 = vsel %vm818_vm1, %v1853_v35, 0  ;;  %s2329_s19 = sshll.u32 %s3187_s7, 4  ;;  %s2330_s19 = int_to_ptr.vmem [resolvable:$true] %s2329_s19 }
 0x1fc   :  { %3056 = vmatprep.subr.bf16.mxu1 %v3055_v50  ;;  %v1930_v18 = vand.u32 4294901760, %v1861_v17  ;;  %s3159_s20 = scalar_lea.vmem %s2330_s19, 128  ;;  %p3164_p1 = scmp.lt.s32.totalorder %s2330_s19, %s2330_s19 }
 0x1fd   :  { %p3160_p0 = scmp.ne.s32.totalorder %s2330_s19, %s3159_s20  ;;  %p3165_p2 = scmp.lt.s32.totalorder %s3159_s20, %s3159_s20 }
 0x1fe   :  { %v1931_v43 = vsub.f32 %v1861_v17, %v1930_v18 }
 0x1ff   :  { %p3166_p3 = por %p3165_p2, %p3164_p1 }
 0x200   :  { %v1932_v55 = vand.u32 4294901760, %v1931_v43 }
 0x201   :  { %p3167_p4 = pnand %p3166_p3, %p3160_p0 }
 0x202   :  { %2747 = vmatmul.mubr.f32.vlgmr.msra.gmra.mrb[2].mxu1 %v904_v46 }
 0x203   :  { %3058 = vmatpush3.bf16.msra.mxu1 %v3055_v50  ;;  %2753 = vmatprep.mubr.f32.mxu1 %v3596_v49 }
 0x204   :  { %3060 = vmatprep.subr.bf16.mxu1 %v3039_v51 }
 0x20a   :  { %2754 = vmatmul.mubr.f32.vlgmr.msra.gmra.mrb[2].mxu1 %v902_v13 }
 0x20b   :  { %3062 = vmatpush3.bf16.msra.mxu1 %v3039_v51  ;;  %2760 = vmatprep.mubr.f32.mxu1 %v3596_v49  ;;  %v1933_v51 = vsub.f32 %v1931_v43, %v1932_v55 }
 0x20d   :  { %v1934_v4 = vand.u32 4294901760, %v1933_v51 }
 0x212   :  { %2761 = vmatmul.mubr.f32.vlgmr.msra.gmra.mrb[2].mxu1 %v902_v13  ;;  %v3184_v13 = vmov 0.0|0.0  }
 0x213   :  { %2767 = vmatprep.mubr.f32.mxu1 %v1420_v24 }
 0x2e5   :  { %v2762_v39 = vpop.f32.mrb[2].mxu1 }
 0x2e6   :  { %v3109_v61 = vadd.f32 %v2762_v39, %v816_v38  ;;  %v1317_v62 = vpop.f32.mrb[3].mxu1 }
 0x2e7   :  { %v3110_v8 = vadd.f32 %v1317_v62, %v811_v32 }
 0x2e8   :  { %v1328_v27 = vmax.f32 %v3109_v61, 0.0 }
 0x2e9   :  { %v1327_v30 = vmax.f32 %v3110_v8, 0.0 }
 0x2ea   :  { %v1353_v48 = vand.u32 4294901760, %v1328_v27 }
 0x2eb   :  { %v1350_v16 = vand.u32 4294901760, %v1327_v30 }
 0x2ec   :  { %v1445_v33 = vsub.f32 %v1328_v27, %v1353_v48 }
 0x2ed   :  { %v3063_v40 = vpack.c.bf16 %v1353_v48, %v1350_v16  ;;  %v1438_v49 = vsub.f32 %v1327_v30, %v1350_v16 }
 0x2ee   :  { %v1446_v57 = vand.u32 4294901760, %v1445_v33 }
 0x2ef   :  { %v1439_v63 = vand.u32 4294901760, %v1438_v49  ;;  %3064 = vmatprep.subr.bf16.mxu1 %v3063_v40  ;;  %v3071_v7 = vpack.c.bf16 %v1445_v33, %v1438_v49 }
 0x2f0   :  { %3066 = vmatpush3.bf16.msra.mxu1 %v3063_v40  ;;  %v1447_v15 = vsub.f32 %v1445_v33, %v1446_v57 }
 0x2f1   :  { %v1440_v26 = vsub.f32 %v1438_v49, %v1439_v63  ;;  %v3079_v37 = vpack.c.bf16 %v1446_v57, %v1439_v63 }
 0x2f2   :  { %v1448_v53 = vand.u32 4294901760, %v1447_v15 }
 0x2f3   :  { %2768 = vmatmul.mubr.f32.vlgmr.msra.gmra.mrb[4].mxu1 %v1430_v6  ;;  %v1441_v5 = vand.u32 4294901760, %v1440_v26 }
 0x2f4   :  { %2774 = vmatprep.mubr.f32.mxu1 %v1416_v2 }
 0x2f5   :  { %v3067_v10 = vpack.c.bf16 %v1448_v53, %v1441_v5 }
 0x2f7   :  { %3068 = vmatprep.subr.bf16.mxu1 %v3067_v10 }
 0x2f8   :  { %3070 = vmatpush3.bf16.msra.mxu1 %v3067_v10 }
 0x2f9   :  { %3072 = vmatprep.subr.bf16.mxu1 %v3071_v7 }
 0x2fb   :  { %2775 = vmatmul.mubr.f32.vlgmr.msra.gmra.mrb[4].mxu1 %v1426_v34 }
 0x2fc   :  { %3074 = vmatpush3.bf16.msra.mxu1 %v3071_v7  ;;  %2781 = vmatprep.mubr.f32.mxu1 %v1417_v3  ;;  %v1858_v3 = vpop.permute.xlu0 %1857 }
 0x2fd   :  { %3076 = vmatprep.subr.bf16.mxu1 %v3063_v40 }
 0x303   :  { %2782 = vmatmul.mubr.f32.vlgmr.msra.gmra.mrb[4].mxu1 %v1427_v25 }
 0x304   :  { %3078 = vmatpush3.bf16.msra.mxu1 %v3063_v40  ;;  %2788 = vmatprep.mubr.f32.mxu1 %v1418_v11 }
 0x305   :  { %3080 = vmatprep.subr.bf16.mxu1 %v3079_v37 }
 0x30b   :  { %2789 = vmatmul.mubr.f32.vlgmr.msra.gmra.mrb[4].mxu1 %v1428_v9 }
 0x30c   :  { %3082 = vmatpush3.bf16.msra.mxu1 %v3079_v37  ;;  %2795 = vmatprep.mubr.f32.mxu1 %v1416_v2 }
 0x30d   :  { %3084 = vmatprep.subr.bf16.mxu1 %v3063_v40 }
 0x313   :  { %2796 = vmatmul.mubr.f32.vlgmr.msra.gmra.mrb[4].mxu1 %v1426_v34 }
 0x314   :  { %3086 = vmatpush3.bf16.msra.mxu1 %v3063_v40  ;;  %2802 = vmatprep.mubr.f32.mxu1 %v1416_v2 }
 0x315   :  { %3087 = vmatprep.subr.bf16.mxu1 %v3184_v13 }
 0x31b   :  { %2803 = vmatmul.mubr.f32.vlgmr.msra.gmra.mrb[4].mxu1 %v1426_v34 }
 0x31c   :  { %2809 = vmatprep.mubr.msk.f32.mxu1 %vm3185_vm2, %v3186_v31 }
 0x3ee   :  { %v2804_v36 = vpop.f32.mrb[4].mxu1 }
 0x3ef   :  { %v3111_v46 = vadd.f32 %v2804_v36, %v1341_v44  ;;  %v1841_v54 = vpop.f32.mrb[5].mxu1 }
 0x3f0   :  { %v3112_v56 = vadd.f32 %v1841_v54, %v1336_v45 }
 0x3f1   :  { %v1852_v60 = vmax.f32 %v3111_v46, 0.0 }
 0x3f2   :  { %v1851_v19 = vmax.f32 %v3112_v56, 0.0 }
 0x3f3   :  { %v1867_v21 = vand.u32 4294901760, %v1852_v60 }
 0x3f4   :  { %v1864_v52 = vand.u32 4294901760, %v1851_v19 }
 0x3f5   :  { %v1949_v28 = vsub.f32 %v1852_v60, %v1867_v21 }
 0x3f6   :  { %v3088_v29 = vpack.c.bf16 %v1867_v21, %v1864_v52  ;;  %v1942_v58 = vsub.f32 %v1851_v19, %v1864_v52 }
 0x3f7   :  { %v1950_v59 = vand.u32 4294901760, %v1949_v28 }
 0x3f8   :  { %v1943_v47 = vand.u32 4294901760, %v1942_v58  ;;  %3089 = vmatpush3.bf16.msra.mxu1 %v3088_v29  ;;  %v3094_v50 = vpack.c.bf16 %v1949_v28, %v1942_v58 }
 0x3f9   :  { %v1951_v41 = vsub.f32 %v1949_v28, %v1950_v59  ;;  %3090 = vmatprep.subr.bf16.mxu1 %v3184_v13 }
 0x3fa   :  { %v1944_v42 = vsub.f32 %v1942_v58, %v1943_v47  ;;  %v3100_v0 = vpack.c.bf16 %v1950_v59, %v1943_v47 }
 0x3fb   :  { %v1952_v1 = vand.u32 4294901760, %v1951_v41  ;;  %2810 = vmatmul.mubr.f32.vlgmr.msra.gmra.mrb[6].mxu1 %v1934_v4 }
 0x3fc   :  { %v1945_v14 = vand.u32 4294901760, %v1944_v42  ;;  %2816 = vmatprep.mubr.msk.f32.mxu1 %vm3185_vm2, %v3186_v31 }
 0x3fe   :  { %v3091_v2 = vpack.c.bf16 %v1952_v1, %v1945_v14 }
 0x400   :  { %3092 = vmatpush3.bf16.msra.mxu1 %v3091_v2 }
 0x401   :  { %3093 = vmatprep.subr.bf16.mxu1 %v3184_v13 }
 0x403   :  { %2817 = vmatmul.mubr.f32.vlgmr.msra.gmra.mrb[6].mxu1 %v1930_v18 }
 0x404   :  { %3095 = vmatpush3.bf16.msra.mxu1 %v3094_v50  ;;  %2823 = vmatprep.mubr.msk.f32.mxu1 %vm3185_vm2, %v3186_v31 }
 0x405   :  { %3096 = vmatprep.subr.bf16.mxu1 %v3184_v13 }
 0x40b   :  { %2824 = vmatmul.mubr.f32.vlgmr.msra.gmra.mrb[6].mxu1 %v1931_v43 }
 0x40c   :  { %3098 = vmatpush3.bf16.msra.mxu1 %v3088_v29  ;;  %2830 = vmatprep.mubr.msk.f32.mxu1 %vm3185_vm2, %v3186_v31 }
 0x40d   :  { %3099 = vmatprep.subr.bf16.mxu1 %v3184_v13 }
 0x413   :  { %2831 = vmatmul.mubr.f32.vlgmr.msra.gmra.mrb[6].mxu1 %v1932_v55 }
 0x414   :  { %3101 = vmatpush3.bf16.msra.mxu1 %v3100_v0  ;;  %2837 = vmatprep.mubr.msk.f32.mxu1 %vm3185_vm2, %v3186_v31 }
 0x415   :  { %3102 = vmatprep.subr.bf16.mxu1 %v3184_v13 }
 0x41b   :  { %2838 = vmatmul.mubr.f32.vlgmr.msra.gmra.mrb[6].mxu1 %v1930_v18 }
 0x41c   :  { %3104 = vmatpush3.bf16.msra.mxu1 %v3088_v29  ;;  %2844 = vmatprep.mubr.msk.f32.mxu1 %vm3185_vm2, %v3186_v31 }
 0x423   :  { %2845 = vmatmul.mubr.f32.vlgmr.msra.gmra.mrb[6].mxu1 %v1930_v18 }
 0x4f6   :  { %v2318_v11 = vpop.f32.mrb[6].mxu1 }
 0x4f7   :  { %v3113_v12 = vadd.f32 %v2318_v11, %v1858_v3  ;;  %v2846_v24 = vpop.f32.mrb[7].mxu1 }
 0x4f9   :  { %2322 = vst [vmem:[#allocation2] sm:$0xff] %v3113_v12 }
 0x4fa   :  { %3170 = shalt.err (!%p3167_p4)
}
 0x4fb   :  { %s3171_s22 = scalar_lea.hbm %s3654_s9, 128 }
 0x4fc   :  { %p3172_p5 = scmp.ne.s32.totalorder %s3654_s9, %s3171_s22  ;;  %p3175_p6 = scmp.lt.u32.totalorder %s3171_s22, %s3654_s9 }
 0x4fe   :  { %p3177_p7 = pnand %p3175_p6, %p3172_p5 }
 0x500   :  { %3180 = shalt.err (!%p3177_p7)
}
 0x501   :  { %2332 = dma.vmem_to_hbm [thread:$0]  %s2330_s19, 128, %s3654_s9, [#allocation3]  }
 0x502   :  { %3181 = dma.done.wait [#allocation3], 128  }
 0x503   :  { %3182 = vsyncadd [#allocation3], 4294967168 }
 0x504   :  { %2336 = vsyncpa [#allocation3], 1 }

</bundles_post_ra>
